<compile_context>
chip_gen: v5e
topology: v5e:2x2
jax: 0.10.0
libtpu: 0.0.40
codegen_flags: <defaults>
</compile_context>

<pallas_src>
import jax
import jax.numpy as jnp
from jax.experimental import pallas as pl
from jax.experimental.pallas import tpu as pltpu


_LANE = 128
_LANE_TARGET = 2048                 # do not fold the lane dim past this
_TILE_BYTES = 2 * 1024 * 1024       # byte budget per x/out tile buffer
_MIN_SPLIT_ELEMS = 1 << 17          # split a single-block grid past ~512 KiB f32


def generate_encoder(in_channels: int, max_len: int) -> jnp.ndarray:
    """Sinusoidal position table, exactly mirroring PyTorch generate_encoder."""
    pos = jnp.arange(max_len, dtype=jnp.float32)[:, None]            # [max_len, 1]
    i = jnp.arange(in_channels, dtype=jnp.float32)[None, :]          # [1, C]
    angle_rates = 1.0 / jnp.power(10000.0, 2.0 * jnp.floor(i / 2.0) / in_channels)
    pe = pos * angle_rates                                            # [max_len, C]
    even = (jnp.arange(in_channels) % 2 == 0)[None, :]                # [1, C]
    return jnp.where(even, jnp.sin(pe), jnp.cos(pe)).astype(jnp.float32)


def _sublane_multiple(itemsize: int) -> int:
    return {4: 8, 2: 16, 1: 32}.get(itemsize, 8)


def _choose_fold(T: int, C: int) -> int:
    """Smallest T2 dividing T with (T2*C) % 128 == 0 and T2*C <= lane target."""
    if C % _LANE == 0:
        return 1
    for t2 in range(1, T + 1):
        if T % t2:
            continue
        w = t2 * C
        if w > max(_LANE_TARGET, C):
            break
        if w % _LANE == 0:
            return t2
    return 1   # fallback: lane dim = C (full-extent last dim, still legal)


def _choose_tiles(B: int, T1: int, W: int, itemsize: int):
    """Byte-budgeted (batch, seq) tile sizes for the folded (B, T1, W) layout."""
    smin = _sublane_multiple(itemsize)
    max_elems = max(1, _TILE_BYTES // itemsize)
    if T1 * W <= max_elems:
        bt = T1                                           # full seq -> no edge mask
        bb = min(B, max(1, max_elems // (T1 * W)))
    else:
        bb = 1
        bt = min(T1, max(smin, (max_elems // W) // smin * smin))
    # v7x megacore: make sure a "parallel" axis has >= 2 blocks when it matters.
    if pl.cdiv(T1, bt) * pl.cdiv(B, bb) == 1 and B * T1 * W >= _MIN_SPLIT_ELEMS:
        if B >= 2:
            bb = pl.cdiv(B, 2)
        elif T1 >= 2 * smin:
            bt = max(smin, pl.cdiv(T1 // 2, smin) * smin)
    return bb, bt


def _add_pe_kernel(x_ref, pe_ref, o_ref):
    # x_ref/o_ref: (bb, bt, W) tiles; pe_ref: (bt, W) float32, broadcast over
    # the leading batch dim (cheap; no sublane relayout). Add in f32, cast on store.
    o_ref[...] = (x_ref[...].astype(jnp.float32)
                  + pe_ref[...][None, :, :]).astype(o_ref.dtype)


@jax.jit
def position_encoder_1d(x: jnp.ndarray, pe_table: jnp.ndarray, point=-1):
    """Forward pass of PositionEncoder1D (eval mode, dropout == identity).

    x:        [B, T, C]
    pe_table: [max_len, C] float32 sinusoidal table
    point:    traced scalar; -1 -> out = x + pe[:T]
              >=0            -> out = x + pe[point][None, :] (broadcast over T)
    """
    B, T, C = x.shape
    point = jnp.asarray(point, jnp.int32)

    # Build the (T, C) PE operand for both branches under one compilation.
    start = jnp.clip(point, 0, pe_table.shape[0] - 1)
    row = jax.lax.dynamic_slice(pe_table, (start, 0), (1, C))        # [1, C]
    pe_seq = pe_table[:T, :]                                          # [T, C]
    pe_slice = jnp.where(point < 0, pe_seq, jnp.broadcast_to(row, (T, C)))  # f32

    # Fold part of T into the lane axis: x -> (B, T1, W), pe -> (T1, W).
    t2 = _choose_fold(T, C)
    T1, W = T // t2, t2 * C
    x3 = x.reshape(B, T1, W)
    pe2 = pe_slice.reshape(T1, W)            # stays float32; add is done in f32

    bb, bt = _choose_tiles(B, T1, W, x.dtype.itemsize)
    grid = (pl.cdiv(T1, bt), pl.cdiv(B, bb))   # sequence blocks slow, batch fast

    out3 = pl.pallas_call(
        _add_pe_kernel,
        out_shape=jax.ShapeDtypeStruct((B, T1, W), x.dtype),
        grid_spec=pltpu.PrefetchScalarGridSpec(
            num_scalar_prefetch=0,
            grid=grid,
            in_specs=[
                pl.BlockSpec((bb, bt, W), lambda tj, bi: (bi, tj, 0)),
                # PE block index depends only on the slow axis, so its re-fetch
                # is elided across all inner (batch) grid steps.
                pl.BlockSpec((bt, W), lambda tj, bi: (tj, 0)),
            ],
            out_specs=pl.BlockSpec((bb, bt, W), lambda tj, bi: (bi, tj, 0)),
        ),
        compiler_params=pltpu.CompilerParams(
            dimension_semantics=("parallel", "parallel"),
            # ~2 MiB x + ~2 MiB out (double-buffered) + resident PE block:
            # comfortably under 32 MiB on v5e/v6e/v7x; raises v5e's 16 MiB default.
            vmem_limit_bytes=32 * 1024 * 1024,
        ),
    )(x3, pe2)

    return out3.reshape(B, T, C)


if __name__ == "__main__":
    MAX_LEN = 500
    k1, k2 = jax.random.split(jax.random.PRNGKey(0))

    # Small shapes consistent with the module's forward: x is [B, T, C].
    B, T, C = 2, 8, 32
    x = jax.random.normal(k1, (B, T, C), dtype=jnp.float32)
    pe_table = generate_encoder(C, MAX_LEN)

    out = jax.block_until_ready(position_encoder_1d(x, pe_table, -1))
    out_pt = jax.block_until_ready(position_encoder_1d(x, pe_table, 3))   # same compile

    ref = x + pe_table[None, :T, :]
    ref_pt = x + pe_table[3][None, None, :]
    assert jnp.allclose(out, ref, atol=1e-6), "point=-1 branch mismatch"
    assert jnp.allclose(out_pt, ref_pt, atol=1e-6), "point>=0 branch mismatch"

    # Larger shape exercising the folded, multi-block grid path (still quick).
    B2, T2, C2 = 8, 256, 256
    x_big = jax.random.normal(k2, (B2, T2, C2), dtype=jnp.float32)
    pe_table2 = generate_encoder(C2, MAX_LEN)
    out_big = jax.block_until_ready(position_encoder_1d(x_big, pe_table2, -1))
    ref_big = x_big + pe_table2[None, :T2, :]
    assert jnp.allclose(out_big, ref_big, atol=1e-6), "tiled grid mismatch"

    print("KERNEL_OK")
</pallas_src>

<mosaic_0001>
module attributes {stable_mosaic.version = 11 : i64} {
  func.func @_add_pe_kernel(%arg0: i32, %arg1: i32, %arg2: memref<2x2x128xf32, #tpu.memory_space<vmem>>, %arg3: memref<2x128xf32, #tpu.memory_space<vmem>>, %arg4: memref<2x2x128xf32, #tpu.memory_space<vmem>>) attributes {dimension_semantics = [#tpu.dimension_semantics<parallel>, #tpu.dimension_semantics<parallel>], iteration_bounds = array<i64: 1, 1>, scalar_prefetch = 0 : i64, scratch_operands = 0 : i64, tpu.core_type = #tpu.core_type<tc>, window_params = [{transform_indices = @transform_0, window_bounds = array<i64: 2, 2, 128>}, {transform_indices = @transform_1, window_bounds = array<i64: 2, 128>}, {transform_indices = @transform_2, window_bounds = array<i64: 2, 2, 128>}]} {
    %c0 = arith.constant 0 : index
    %c0_0 = arith.constant 0 : index
    %c0_1 = arith.constant 0 : index
    %0 = vector.load %arg2[%c0, %c0_0, %c0_1] : memref<2x2x128xf32, #tpu.memory_space<vmem>>, vector<2x2x128xf32>
    %c0_2 = arith.constant 0 : index
    %c0_3 = arith.constant 0 : index
    %1 = vector.load %arg3[%c0_2, %c0_3] : memref<2x128xf32, #tpu.memory_space<vmem>>, vector<2x128xf32>
    %2 = vector.shape_cast %1 : vector<2x128xf32> to vector<1x2x128xf32>
    %3 = vector.broadcast %2 : vector<1x2x128xf32> to vector<2x2x128xf32>
    %4 = arith.addf %0, %3 : vector<2x2x128xf32>
    %c0_4 = arith.constant 0 : index
    %c0_5 = arith.constant 0 : index
    %c0_6 = arith.constant 0 : index
    %5 = vector.load %arg4[%c0_4, %c0_5, %c0_6] : memref<2x2x128xf32, #tpu.memory_space<vmem>>, vector<2x2x128xf32>
    tpu.vector_store %arg4[%c0_4, %c0_5, %c0_6], %4 {strides = array<i32>} : memref<2x2x128xf32, #tpu.memory_space<vmem>>, vector<2x2x128xf32>,
    return
  }
  func.func @transform_0(%arg0: i32, %arg1: i32) -> (i32, i32, i32) {
    %c0_i32 = arith.constant 0 : i32
    %c0_i32_0 = arith.constant 0 : i32
    return %arg1, %arg0, %c0_i32 : i32, i32, i32
  }
  func.func @transform_1(%arg0: i32, %arg1: i32) -> (i32, i32) {
    %c0_i32 = arith.constant 0 : i32
    %c0_i32_0 = arith.constant 0 : i32
    return %arg0, %c0_i32 : i32, i32
  }
  func.func @transform_2(%arg0: i32, %arg1: i32) -> (i32, i32, i32) {
    %c0_i32 = arith.constant 0 : i32
    %c0_i32_0 = arith.constant 0 : i32
    return %arg1, %arg0, %c0_i32 : i32, i32, i32
  }
}

</mosaic_0001>

<bundles_post_ra>
// kernel: position_encoder_1d.1
= control target key start
LH: loop header
LB: loop body
LE: loop exit
PB: predicated region body
PF: predicated region fallthrough
CT: control target
= control target key end

     0   :  { %s52_s0 = inlined_call_operand.vmem [shape: f32[2,2,128], index: 0, kind: input, shape index: {}]   ;;  %s53_s1 = inlined_call_operand.vmem [shape: f32[2,128], index: 1, kind: input, shape index: {}]   ;;  %s54_s2 = inlined_call_operand.vmem [shape: f32[2,2,128], index: 2, kind: output, shape index: {}]  }
   0x1   :  { %v11_v0 = vld [vmem:[%s52_s0] sm:$0x3]  ;;  %v12_v2 = vld [vmem:[%s52_s0 + $0x2] sm:$0x3] }
   0x2   :  { %v13_v1 = vld [vmem:[%s53_s1] sm:$0x3] }
   0x3   :  { %v14_v3 = vadd.f32 %v13_v1, %v11_v0  ;;  %v15_v4 = vadd.f32 %v13_v1, %v12_v2 }
   0x5   :  { %16 = vst [vmem:[%s54_s2] sm:$0x3] %v14_v3 }
   0x6   :  { %17 = vst [vmem:[%s54_s2 + $0x2] sm:$0x3] %v15_v4 }

</bundles_post_ra>
